<compile_context>
chip_gen: v6e
topology: v6e:2x2x1
jax: 0.10.0
libtpu: 0.0.40
codegen_flags: <defaults>
</compile_context>

<pallas_src>
import functools

import numpy as np
import jax
import jax.numpy as jnp
from jax.experimental import pallas as pl
from jax.experimental.pallas import tpu as pltpu


def _uncertainty_kernel(x_ref, w1_ref, b1_ref, w2_ref, b2_ref, mask_ref, out_ref,
                        *, H, W):
    """One batch block per grid step, channels-major, batch folded into sublanes.

    x_ref   : (NB*Cin,  HW)          lane-dense input slab (NCHW rows, flat HW lanes)
    w1_ref  : (9, NB*Cmid, NB*Cin)   per-tap block-diagonal 3x3 conv weights
    b1_ref  : (NB*Cmid, 1)
    w2_ref  : (NB*Cout, NB*Cmid)     block-diagonal 1x1 conv weights
    b2_ref  : (NB*Cout, 1)
    mask_ref: (9, NB*Cin, HW)        per-tap zero-padding masks (pre-broadcast)
    out_ref : (NB*Cout, HW)          lane-dense output slab
    """
    HW = H * W
    x = x_ref[...]                                   # (NB*Cin, HW)

    # conv1 (3x3, SAME): start with the center tap (no shift, no mask) with the
    # bias folded into its add, then accumulate the 8 shifted taps.  Each shift
    # is a single XLU lane rotation; wrap-around reads are zeroed by the
    # precomputed per-tap mask, which implements the SAME zero padding.
    acc = jnp.dot(w1_ref[4], x, preferred_element_type=jnp.float32) + b1_ref[...]
    for dh in range(3):
        for dw in range(3):
            t = dh * 3 + dw
            if t == 4:
                continue                             # center tap already done
            off = (dh - 1) * W + (dw - 1)
            shifted = pltpu.roll(x, shift=(-off) % HW, axis=1)
            tap = shifted * mask_ref[t]
            acc = acc + jnp.dot(w1_ref[t], tap,
                                preferred_element_type=jnp.float32)
    h = jnp.maximum(acc, 0.0)                        # (NB*Cmid, HW)

    # conv2 (1x1) + sigmoid, still channels-major / lane-dense.
    y = jnp.dot(w2_ref[...], h, preferred_element_type=jnp.float32) + b2_ref[...]
    out_ref[...] = jax.nn.sigmoid(y).astype(out_ref.dtype)


def _num_batch_blocks(N, Cin, Cout):
    """2 parallel grid steps (one per v7x TensorCore) only if each half-batch
    block stays (8,128) sublane-tile aligned; otherwise a single step, which is
    fastest on single-TC v5e/v6e where per-step overhead dominates this body."""
    if N % 2 == 0:
        nb = N // 2
        if (nb * Cin) % 8 == 0 and (nb * Cout) % 8 == 0:
            return 2
    return 1


def uncertainty_head(x_nchw, w1, b1, w2, b2):
    """Forward pass of UncertaintyHead.

    x_nchw: (N, Cin, H, W) float32  (PyTorch NCHW convention)
    w1: (3, 3, Cin, Cmid) HWIO, b1: (Cmid,)
    w2: (Cmid, Cout),           b2: (Cout,)
    Returns (N, Cout, H, W).
    """
    N, Cin, H, W = x_nchw.shape
    Cmid = w1.shape[-1]
    Cout = w2.shape[-1]
    HW = H * W

    G = _num_batch_blocks(N, Cin, Cout)
    NB = N // G                                      # batch elements per grid step

    # Free (bitcast-only) reshape: batch/channel rows on sublanes, flat HW on
    # lanes.  No transpose, no pad, no extra HBM passes.
    x_slab = x_nchw.reshape(N * Cin, HW)

    # Block-diagonal (over the NB-element batch block) channels-major weights.
    eye_nb = jnp.eye(NB, dtype=w1.dtype)
    w_taps = jnp.transpose(w1, (0, 1, 3, 2)).reshape(9, Cmid, Cin)     # [t, co, ci]
    w1_bd = jnp.einsum("nm,toc->tnomc", eye_nb, w_taps)
    w1_bd = w1_bd.reshape(9, NB * Cmid, NB * Cin)
    w2_bd = jnp.einsum("nm,oc->nomc", eye_nb, w2.T).reshape(NB * Cout, NB * Cmid)
    b1_bd = jnp.tile(b1, NB).reshape(NB * Cmid, 1)
    b2_bd = jnp.tile(b2, NB).reshape(NB * Cout, 1)

    # Per-tap validity masks (the zero padding of the SAME conv), built with
    # numpy at trace time (compile-time constant) and pre-broadcast over the
    # NB*Cin sublane rows so the kernel only does aligned vector loads.
    ii = np.arange(H)[:, None]
    jj = np.arange(W)[None, :]
    mask_rows = []
    for dh in range(3):
        for dw in range(3):
            valid = ((ii + dh - 1 >= 0) & (ii + dh - 1 < H) &
                     (jj + dw - 1 >= 0) & (jj + dw - 1 < W))
            mask_rows.append(valid.reshape(HW))
    mask_np = np.stack(mask_rows, axis=0).astype(np.float32)            # (9, HW)
    mask_bd = jnp.asarray(np.ascontiguousarray(
        np.broadcast_to(mask_np[:, None, :], (9, NB * Cin, HW))))

    kernel = functools.partial(_uncertainty_kernel, H=H, W=W)

    out_slab = pl.pallas_call(
        kernel,
        out_shape=jax.ShapeDtypeStruct((N * Cout, HW), jnp.float32),
        grid_spec=pltpu.PrefetchScalarGridSpec(
            num_scalar_prefetch=0,
            grid=(G,),
            in_specs=[
                pl.BlockSpec((NB * Cin, HW), lambda g: (g, 0)),
                pl.BlockSpec((9, NB * Cmid, NB * Cin), lambda g: (0, 0, 0)),
                pl.BlockSpec((NB * Cmid, 1), lambda g: (0, 0)),
                pl.BlockSpec((NB * Cout, NB * Cmid), lambda g: (0, 0)),
                pl.BlockSpec((NB * Cout, 1), lambda g: (0, 0)),
                pl.BlockSpec((9, NB * Cin, HW), lambda g: (0, 0, 0)),
            ],
            out_specs=pl.BlockSpec((NB * Cout, HW), lambda g: (g, 0)),
        ),
        compiler_params=pltpu.CompilerParams(
            dimension_semantics=("parallel",),
        ),
    )(x_slab, w1_bd, b1_bd, w2_bd, b2_bd, mask_bd)

    # (N*Cout, HW) -> (N, Cout, H, W) is a free row-major bitcast.
    return out_slab.reshape(N, Cout, H, W)


def _reference(x_nchw, w1, b1, w2, b2):
    """Pure-JAX reference (lax conv) for correctness checking."""
    x = jnp.transpose(x_nchw, (0, 2, 3, 1))  # NHWC
    dn = jax.lax.conv_dimension_numbers(x.shape, w1.shape, ("NHWC", "HWIO", "NHWC"))
    h = jax.lax.conv_general_dilated(x, w1, (1, 1), "SAME", dimension_numbers=dn) + b1
    h = jnp.maximum(h, 0.0)
    w2_hwio = w2.reshape(1, 1, *w2.shape)
    dn2 = jax.lax.conv_dimension_numbers(h.shape, w2_hwio.shape, ("NHWC", "HWIO", "NHWC"))
    y = jax.lax.conv_general_dilated(h, w2_hwio, (1, 1), "SAME", dimension_numbers=dn2) + b2
    u = jax.nn.sigmoid(y)
    return jnp.transpose(u, (0, 3, 1, 2))


if __name__ == "__main__":
    # Small shapes consistent with the module: N=2, Cin=4, H=W=16, Cout=1.
    N, Cin, H, W = 2, 4, 16, 16
    Cmid, Cout = Cin // 2, 1

    key = jax.random.PRNGKey(0)
    kx, kw1, kb1, kw2, kb2 = jax.random.split(key, 5)

    x = jax.random.normal(kx, (N, Cin, H, W), dtype=jnp.float32)
    # Deterministic parameter init (synthetic weights, HWIO layout).
    w1 = jax.random.normal(kw1, (3, 3, Cin, Cmid), dtype=jnp.float32) * 0.1
    b1 = jax.random.normal(kb1, (Cmid,), dtype=jnp.float32) * 0.1
    w2 = jax.random.normal(kw2, (Cmid, Cout), dtype=jnp.float32) * 0.1
    b2 = jax.random.normal(kb2, (Cout,), dtype=jnp.float32) * 0.1

    out = jax.jit(uncertainty_head)(x, w1, b1, w2, b2)
    out = jax.block_until_ready(out)

    ref = _reference(x, w1, b1, w2, b2)
    assert out.shape == (N, Cout, H, W)
    assert jnp.allclose(out, ref, atol=1e-5, rtol=1e-5), "mismatch vs reference"

    print("KERNEL_OK")
</pallas_src>

<mosaic_0001>
module attributes {stable_mosaic.version = 11 : i64} {
  func.func @_uncertainty_kernel(%arg0: i32, %arg1: memref<8x256xf32, #tpu.memory_space<vmem>>, %arg2: memref<9x4x8xf32, #tpu.memory_space<vmem>>, %arg3: memref<4x1xf32, #tpu.memory_space<vmem>>, %arg4: memref<2x4xf32, #tpu.memory_space<vmem>>, %arg5: memref<2x1xf32, #tpu.memory_space<vmem>>, %arg6: memref<9x8x256xf32, #tpu.memory_space<vmem>>, %arg7: memref<2x256xf32, #tpu.memory_space<vmem>>) attributes {dimension_semantics = [#tpu.dimension_semantics<parallel>], iteration_bounds = array<i64: 1>, scalar_prefetch = 0 : i64, scratch_operands = 0 : i64, tpu.core_type = #tpu.core_type<tc>, window_params = [{transform_indices = @transform_0, window_bounds = array<i64: 8, 256>}, {pipeline_mode = #tpu.pipeline_mode<synchronous>, transform_indices = @transform_1, window_bounds = array<i64: 9, 4, 8>}, {pipeline_mode = #tpu.pipeline_mode<synchronous>, transform_indices = @transform_2, window_bounds = array<i64: 4, 1>}, {pipeline_mode = #tpu.pipeline_mode<synchronous>, transform_indices = @transform_3, window_bounds = array<i64: 2, 4>}, {pipeline_mode = #tpu.pipeline_mode<synchronous>, transform_indices = @transform_4, window_bounds = array<i64: 2, 1>}, {pipeline_mode = #tpu.pipeline_mode<synchronous>, transform_indices = @transform_5, window_bounds = array<i64: 9, 8, 256>}, {transform_indices = @transform_6, window_bounds = array<i64: 2, 256>}]} {
    %c0 = arith.constant 0 : index
    %c0_0 = arith.constant 0 : index
    %0 = vector.load %arg1[%c0, %c0_0] : memref<8x256xf32, #tpu.memory_space<vmem>>, vector<8x256xf32>
    %c4 = arith.constant 4 : index
    %c0_1 = arith.constant 0 : index
    %c0_2 = arith.constant 0 : index
    %1 = vector.load %arg2[%c4, %c0_1, %c0_2] : memref<9x4x8xf32, #tpu.memory_space<vmem>>, vector<1x4x8xf32>
    %2 = vector.shape_cast %1 : vector<1x4x8xf32> to vector<4x8xf32>
    %cst = arith.constant dense<0.000000e+00> : vector<4x256xf32>
    %3 = tpu.matmul %2, %0, %cst {dimension_numbers = #tpu.dot_dimension_numbers<[1], [0], [0], [1], [0, 0, 1, 1], [], []>} : vector<4x8xf32>, vector<8x256xf32>, vector<4x256xf32> -> vector<4x256xf32>
    %c0_3 = arith.constant 0 : index
    %c0_4 = arith.constant 0 : index
    %4 = vector.load %arg3[%c0_3, %c0_4] : memref<4x1xf32, #tpu.memory_space<vmem>>, vector<4x1xf32>
    %5 = vector.broadcast %4 : vector<4x1xf32> to vector<4x256xf32>
    %6 = arith.addf %3, %5 : vector<4x256xf32>
    %c17_i32 = arith.constant 17 : i32
    %7 = tpu.dynamic_rotate %0 by %c17_i32 dim 1 : vector<8x256xf32>, i32 -> vector<8x256xf32>
    %c0_5 = arith.constant 0 : index
    %c0_6 = arith.constant 0 : index
    %c0_7 = arith.constant 0 : index
    %8 = vector.load %arg6[%c0_5, %c0_6, %c0_7] : memref<9x8x256xf32, #tpu.memory_space<vmem>>, vector<1x8x256xf32>
    %9 = vector.shape_cast %8 : vector<1x8x256xf32> to vector<8x256xf32>
    %10 = arith.mulf %7, %9 : vector<8x256xf32>
    %c0_8 = arith.constant 0 : index
    %c0_9 = arith.constant 0 : index
    %c0_10 = arith.constant 0 : index
    %11 = vector.load %arg2[%c0_8, %c0_9, %c0_10] : memref<9x4x8xf32, #tpu.memory_space<vmem>>, vector<1x4x8xf32>
    %12 = vector.shape_cast %11 : vector<1x4x8xf32> to vector<4x8xf32>
    %cst_11 = arith.constant dense<0.000000e+00> : vector<4x256xf32>
    %13 = tpu.matmul %12, %10, %cst_11 {dimension_numbers = #tpu.dot_dimension_numbers<[1], [0], [0], [1], [0, 0, 1, 1], [], []>} : vector<4x8xf32>, vector<8x256xf32>, vector<4x256xf32> -> vector<4x256xf32>
    %14 = arith.addf %6, %13 : vector<4x256xf32>
    %c16_i32 = arith.constant 16 : i32
    %15 = tpu.dynamic_rotate %0 by %c16_i32 dim 1 : vector<8x256xf32>, i32 -> vector<8x256xf32>
    %c1 = arith.constant 1 : index
    %c0_12 = arith.constant 0 : index
    %c0_13 = arith.constant 0 : index
    %16 = vector.load %arg6[%c1, %c0_12, %c0_13] : memref<9x8x256xf32, #tpu.memory_space<vmem>>, vector<1x8x256xf32>
    %17 = vector.shape_cast %16 : vector<1x8x256xf32> to vector<8x256xf32>
    %18 = arith.mulf %15, %17 : vector<8x256xf32>
    %c1_14 = arith.constant 1 : index
    %c0_15 = arith.constant 0 : index
    %c0_16 = arith.constant 0 : index
    %19 = vector.load %arg2[%c1_14, %c0_15, %c0_16] : memref<9x4x8xf32, #tpu.memory_space<vmem>>, vector<1x4x8xf32>
    %20 = vector.shape_cast %19 : vector<1x4x8xf32> to vector<4x8xf32>
    %cst_17 = arith.constant dense<0.000000e+00> : vector<4x256xf32>
    %21 = tpu.matmul %20, %18, %cst_17 {dimension_numbers = #tpu.dot_dimension_numbers<[1], [0], [0], [1], [0, 0, 1, 1], [], []>} : vector<4x8xf32>, vector<8x256xf32>, vector<4x256xf32> -> vector<4x256xf32>
    %22 = arith.addf %14, %21 : vector<4x256xf32>
    %c15_i32 = arith.constant 15 : i32
    %23 = tpu.dynamic_rotate %0 by %c15_i32 dim 1 : vector<8x256xf32>, i32 -> vector<8x256xf32>
    %c2 = arith.constant 2 : index
    %c0_18 = arith.constant 0 : index
    %c0_19 = arith.constant 0 : index
    %24 = vector.load %arg6[%c2, %c0_18, %c0_19] : memref<9x8x256xf32, #tpu.memory_space<vmem>>, vector<1x8x256xf32>
    %25 = vector.shape_cast %24 : vector<1x8x256xf32> to vector<8x256xf32>
    %26 = arith.mulf %23, %25 : vector<8x256xf32>
    %c2_20 = arith.constant 2 : index
    %c0_21 = arith.constant 0 : index
    %c0_22 = arith.constant 0 : index
    %27 = vector.load %arg2[%c2_20, %c0_21, %c0_22] : memref<9x4x8xf32, #tpu.memory_space<vmem>>, vector<1x4x8xf32>
    %28 = vector.shape_cast %27 : vector<1x4x8xf32> to vector<4x8xf32>
    %cst_23 = arith.constant dense<0.000000e+00> : vector<4x256xf32>
    %29 = tpu.matmul %28, %26, %cst_23 {dimension_numbers = #tpu.dot_dimension_numbers<[1], [0], [0], [1], [0, 0, 1, 1], [], []>} : vector<4x8xf32>, vector<8x256xf32>, vector<4x256xf32> -> vector<4x256xf32>
    %30 = arith.addf %22, %29 : vector<4x256xf32>
    %c1_i32 = arith.constant 1 : i32
    %31 = tpu.dynamic_rotate %0 by %c1_i32 dim 1 : vector<8x256xf32>, i32 -> vector<8x256xf32>
    %c3 = arith.constant 3 : index
    %c0_24 = arith.constant 0 : index
    %c0_25 = arith.constant 0 : index
    %32 = vector.load %arg6[%c3, %c0_24, %c0_25] : memref<9x8x256xf32, #tpu.memory_space<vmem>>, vector<1x8x256xf32>
    %33 = vector.shape_cast %32 : vector<1x8x256xf32> to vector<8x256xf32>
    %34 = arith.mulf %31, %33 : vector<8x256xf32>
    %c3_26 = arith.constant 3 : index
    %c0_27 = arith.constant 0 : index
    %c0_28 = arith.constant 0 : index
    %35 = vector.load %arg2[%c3_26, %c0_27, %c0_28] : memref<9x4x8xf32, #tpu.memory_space<vmem>>, vector<1x4x8xf32>
    %36 = vector.shape_cast %35 : vector<1x4x8xf32> to vector<4x8xf32>
    %cst_29 = arith.constant dense<0.000000e+00> : vector<4x256xf32>
    %37 = tpu.matmul %36, %34, %cst_29 {dimension_numbers = #tpu.dot_dimension_numbers<[1], [0], [0], [1], [0, 0, 1, 1], [], []>} : vector<4x8xf32>, vector<8x256xf32>, vector<4x256xf32> -> vector<4x256xf32>
    %38 = arith.addf %30, %37 : vector<4x256xf32>
    %c255_i32 = arith.constant 255 : i32
    %39 = tpu.dynamic_rotate %0 by %c255_i32 dim 1 : vector<8x256xf32>, i32 -> vector<8x256xf32>
    %c5 = arith.constant 5 : index
    %c0_30 = arith.constant 0 : index
    %c0_31 = arith.constant 0 : index
    %40 = vector.load %arg6[%c5, %c0_30, %c0_31] : memref<9x8x256xf32, #tpu.memory_space<vmem>>, vector<1x8x256xf32>
    %41 = vector.shape_cast %40 : vector<1x8x256xf32> to vector<8x256xf32>
    %42 = arith.mulf %39, %41 : vector<8x256xf32>
    %c5_32 = arith.constant 5 : index
    %c0_33 = arith.constant 0 : index
    %c0_34 = arith.constant 0 : index
    %43 = vector.load %arg2[%c5_32, %c0_33, %c0_34] : memref<9x4x8xf32, #tpu.memory_space<vmem>>, vector<1x4x8xf32>
    %44 = vector.shape_cast %43 : vector<1x4x8xf32> to vector<4x8xf32>
    %cst_35 = arith.constant dense<0.000000e+00> : vector<4x256xf32>
    %45 = tpu.matmul %44, %42, %cst_35 {dimension_numbers = #tpu.dot_dimension_numbers<[1], [0], [0], [1], [0, 0, 1, 1], [], []>} : vector<4x8xf32>, vector<8x256xf32>, vector<4x256xf32> -> vector<4x256xf32>
    %46 = arith.addf %38, %45 : vector<4x256xf32>
    %c241_i32 = arith.constant 241 : i32
    %47 = tpu.dynamic_rotate %0 by %c241_i32 dim 1 : vector<8x256xf32>, i32 -> vector<8x256xf32>
    %c6 = arith.constant 6 : index
    %c0_36 = arith.constant 0 : index
    %c0_37 = arith.constant 0 : index
    %48 = vector.load %arg6[%c6, %c0_36, %c0_37] : memref<9x8x256xf32, #tpu.memory_space<vmem>>, vector<1x8x256xf32>
    %49 = vector.shape_cast %48 : vector<1x8x256xf32> to vector<8x256xf32>
    %50 = arith.mulf %47, %49 : vector<8x256xf32>
    %c6_38 = arith.constant 6 : index
    %c0_39 = arith.constant 0 : index
    %c0_40 = arith.constant 0 : index
    %51 = vector.load %arg2[%c6_38, %c0_39, %c0_40] : memref<9x4x8xf32, #tpu.memory_space<vmem>>, vector<1x4x8xf32>
    %52 = vector.shape_cast %51 : vector<1x4x8xf32> to vector<4x8xf32>
    %cst_41 = arith.constant dense<0.000000e+00> : vector<4x256xf32>
    %53 = tpu.matmul %52, %50, %cst_41 {dimension_numbers = #tpu.dot_dimension_numbers<[1], [0], [0], [1], [0, 0, 1, 1], [], []>} : vector<4x8xf32>, vector<8x256xf32>, vector<4x256xf32> -> vector<4x256xf32>
    %54 = arith.addf %46, %53 : vector<4x256xf32>
    %c240_i32 = arith.constant 240 : i32
    %55 = tpu.dynamic_rotate %0 by %c240_i32 dim 1 : vector<8x256xf32>, i32 -> vector<8x256xf32>
    %c7 = arith.constant 7 : index
    %c0_42 = arith.constant 0 : index
    %c0_43 = arith.constant 0 : index
    %56 = vector.load %arg6[%c7, %c0_42, %c0_43] : memref<9x8x256xf32, #tpu.memory_space<vmem>>, vector<1x8x256xf32>
    %57 = vector.shape_cast %56 : vector<1x8x256xf32> to vector<8x256xf32>
    %58 = arith.mulf %55, %57 : vector<8x256xf32>
    %c7_44 = arith.constant 7 : index
    %c0_45 = arith.constant 0 : index
    %c0_46 = arith.constant 0 : index
    %59 = vector.load %arg2[%c7_44, %c0_45, %c0_46] : memref<9x4x8xf32, #tpu.memory_space<vmem>>, vector<1x4x8xf32>
    %60 = vector.shape_cast %59 : vector<1x4x8xf32> to vector<4x8xf32>
    %cst_47 = arith.constant dense<0.000000e+00> : vector<4x256xf32>
    %61 = tpu.matmul %60, %58, %cst_47 {dimension_numbers = #tpu.dot_dimension_numbers<[1], [0], [0], [1], [0, 0, 1, 1], [], []>} : vector<4x8xf32>, vector<8x256xf32>, vector<4x256xf32> -> vector<4x256xf32>
    %62 = arith.addf %54, %61 : vector<4x256xf32>
    %c239_i32 = arith.constant 239 : i32
    %63 = tpu.dynamic_rotate %0 by %c239_i32 dim 1 : vector<8x256xf32>, i32 -> vector<8x256xf32>
    %c8 = arith.constant 8 : index
    %c0_48 = arith.constant 0 : index
    %c0_49 = arith.constant 0 : index
    %64 = vector.load %arg6[%c8, %c0_48, %c0_49] : memref<9x8x256xf32, #tpu.memory_space<vmem>>, vector<1x8x256xf32>
    %65 = vector.shape_cast %64 : vector<1x8x256xf32> to vector<8x256xf32>
    %66 = arith.mulf %63, %65 : vector<8x256xf32>
    %c8_50 = arith.constant 8 : index
    %c0_51 = arith.constant 0 : index
    %c0_52 = arith.constant 0 : index
    %67 = vector.load %arg2[%c8_50, %c0_51, %c0_52] : memref<9x4x8xf32, #tpu.memory_space<vmem>>, vector<1x4x8xf32>
    %68 = vector.shape_cast %67 : vector<1x4x8xf32> to vector<4x8xf32>
    %cst_53 = arith.constant dense<0.000000e+00> : vector<4x256xf32>
    %69 = tpu.matmul %68, %66, %cst_53 {dimension_numbers = #tpu.dot_dimension_numbers<[1], [0], [0], [1], [0, 0, 1, 1], [], []>} : vector<4x8xf32>, vector<8x256xf32>, vector<4x256xf32> -> vector<4x256xf32>
    %70 = arith.addf %62, %69 : vector<4x256xf32>
    %cst_54 = arith.constant 0.000000e+00 : f32
    %71 = vector.broadcast %cst_54 : f32 to vector<4x256xf32>
    %72 = arith.maximumf %70, %71 : vector<4x256xf32>
    %c0_55 = arith.constant 0 : index
    %c0_56 = arith.constant 0 : index
    %73 = vector.load %arg4[%c0_55, %c0_56] : memref<2x4xf32, #tpu.memory_space<vmem>>, vector<2x4xf32>
    %cst_57 = arith.constant dense<0.000000e+00> : vector<2x256xf32>
    %74 = tpu.matmul %73, %72, %cst_57 {dimension_numbers = #tpu.dot_dimension_numbers<[1], [0], [0], [1], [0, 0, 1, 1], [], []>} : vector<2x4xf32>, vector<4x256xf32>, vector<2x256xf32> -> vector<2x256xf32>
    %c0_58 = arith.constant 0 : index
    %c0_59 = arith.constant 0 : index
    %75 = vector.load %arg5[%c0_58, %c0_59] : memref<2x1xf32, #tpu.memory_space<vmem>>, vector<2x1xf32>
    %76 = vector.broadcast %75 : vector<2x1xf32> to vector<2x256xf32>
    %77 = arith.addf %74, %76 : vector<2x256xf32>
    %78 = arith.negf %77 : vector<2x256xf32>
    %79 = math.exp %78 : vector<2x256xf32>
    %cst_60 = arith.constant 1.000000e+00 : f32
    %80 = vector.broadcast %cst_60 : f32 to vector<2x256xf32>
    %81 = arith.addf %80, %79 : vector<2x256xf32>
    %82 = arith.divf %80, %81 : vector<2x256xf32>
    %c0_61 = arith.constant 0 : index
    %c0_62 = arith.constant 0 : index
    %83 = vector.load %arg7[%c0_61, %c0_62] : memref<2x256xf32, #tpu.memory_space<vmem>>, vector<2x256xf32>
    tpu.vector_store %arg7[%c0_61, %c0_62], %82 {strides = array<i32>} : memref<2x256xf32, #tpu.memory_space<vmem>>, vector<2x256xf32>,
    return
  }
  func.func @transform_0(%arg0: i32) -> (i32, i32) {
    %c0_i32 = arith.constant 0 : i32
    %c0_i32_0 = arith.constant 0 : i32
    return %arg0, %c0_i32 : i32, i32
  }
  func.func @transform_1(%arg0: i32) -> (i32, i32, i32) {
    %c0_i32 = arith.constant 0 : i32
    %c0_i32_0 = arith.constant 0 : i32
    %c0_i32_1 = arith.constant 0 : i32
    %c0_i32_2 = arith.constant 0 : i32
    return %c0_i32, %c0_i32_0, %c0_i32_1 : i32, i32, i32
  }
  func.func @transform_2(%arg0: i32) -> (i32, i32) {
    %c0_i32 = arith.constant 0 : i32
    %c0_i32_0 = arith.constant 0 : i32
    %c0_i32_1 = arith.constant 0 : i32
    return %c0_i32, %c0_i32_0 : i32, i32
  }
  func.func @transform_3(%arg0: i32) -> (i32, i32) {
    %c0_i32 = arith.constant 0 : i32
    %c0_i32_0 = arith.constant 0 : i32
    %c0_i32_1 = arith.constant 0 : i32
    return %c0_i32, %c0_i32_0 : i32, i32
  }
  func.func @transform_4(%arg0: i32) -> (i32, i32) {
    %c0_i32 = arith.constant 0 : i32
    %c0_i32_0 = arith.constant 0 : i32
    %c0_i32_1 = arith.constant 0 : i32
    return %c0_i32, %c0_i32_0 : i32, i32
  }
  func.func @transform_5(%arg0: i32) -> (i32, i32, i32) {
    %c0_i32 = arith.constant 0 : i32
    %c0_i32_0 = arith.constant 0 : i32
    %c0_i32_1 = arith.constant 0 : i32
    %c0_i32_2 = arith.constant 0 : i32
    return %c0_i32, %c0_i32_0, %c0_i32_1 : i32, i32, i32
  }
  func.func @transform_6(%arg0: i32) -> (i32, i32) {
    %c0_i32 = arith.constant 0 : i32
    %c0_i32_0 = arith.constant 0 : i32
    return %arg0, %c0_i32 : i32, i32
  }
}

</mosaic_0001>

<bundles_post_ra>
// kernel: tile.12
= control target key start
LH: loop header
LB: loop body
LE: loop exit
PB: predicated region body
PF: predicated region fallthrough
CT: control target
= control target key end

     0   :  { %s22_s0 = inlined_call_operand.vmem [shape: f32[2], index: 0, kind: input, shape index: {}]   ;;  %s23_s1 = inlined_call_operand.vmem [shape: f32[2,2], index: 1, kind: output, shape index: {}]  }
   0x1   :  { %v4_v0 = vld [vmem:[%s22_s0] ss:$0 sm:$0xff] }
   0x2   :  { %5 = vst [vmem:[%s23_s1] sm:$0x3] %v4_v0 }

// kernel: tile.0
= control target key start
LH: loop header
LB: loop body
LE: loop exit
PB: predicated region body
PF: predicated region fallthrough
CT: control target
= control target key end

     0   :  { %vm8_vm0 = vcmask 7168   ;;  %s42_s0 = inlined_call_operand.vmem [shape: f32[2,2], index: 0, kind: input, shape index: {}]   ;;  %s43_s1 = inlined_call_operand.vmem [shape: f32[4,1], index: 1, kind: output, shape index: {}]  }
   0x1   :  { %v5_v0 = vld [vmem:[%s42_s0] sm:$0x3]  ;;  %s25_s0 = smov 127  }
   0x2   :  { %6 = vst [vmem:[#allocation1] sm:$0x3] %v5_v0 }
   0x9   :  { %v10_v1 = vld [vmem:[#allocation1] sm:$0x3]  }
   0xa   :  { %v7_v2 = vld [vmem:[#allocation1] sm:$0x3]   ;;  %11 = vrot.lane.b32.xlu0 %v10_v1, %s25_s0 }
   0xb   :  { %9 = vst.msk [vmem:[#allocation0] ss:$2 sm:$0x3] %vm8_vm0, %v7_v2  }
  0x7c   :  { %v12_v3 = vpop.permute.xlu0 %11  }
  0x7d   :  { %15 = vst.msk [vmem:[#allocation0 + $0x1] ss:$2 sm:$0x3] %vm8_vm0, %v12_v3  }
  0x84   :  { %v20_v4 = vld [vmem:[#allocation0] sm:$0xf] }
  0x85   :  { %23 = vst [vmem:[%s43_s1] sm:$0xf] %v20_v4 }

// kernel: tile.17
= control target key start
LH: loop header
LB: loop body
LE: loop exit
PB: predicated region body
PF: predicated region fallthrough
CT: control target
= control target key end

     0   :  { %s20_s0 = inlined_call_operand.<no memory space> [shape: f32[], index: 0, kind: input, shape index: {}]   ;;  %s21_s1 = inlined_call_operand.vmem [shape: f32[2,1], index: 1, kind: output, shape index: {}]  }
   0x1   :  { %v2_v0 = vstv %s20_s0 }
   0x2   :  { %3 = vst [vmem:[%s21_s1] sm:$0x3] %v2_v0 }

// kernel: uncertainty_head.1
= control target key start
LH: loop header
LB: loop body
LE: loop exit
PB: predicated region body
PF: predicated region fallthrough
CT: control target
= control target key end

     0   :  { %v1004_v1 = vmov 0.0   ;;  %s1005_s23 = smov 16   ;;  %s1006_s24 = smov 17   ;;  %vm33_vm0 = vcmask 64512   ;;  %v1011_v4 = vmov 0   ;;  %v112_v6 = vlaneseq  ;;  %s1175_s0 = inlined_call_operand.vmem [shape: f32[8,256], index: 0, kind: input, shape index: {}]   ;;  %s1176_s1 = inlined_call_operand.vmem [shape: f32[9,4,8], index: 1, kind: input, shape index: {}]   ;;  %s1177_s2 = inlined_call_operand.vmem [shape: f32[4,1], index: 2, kind: input, shape index: {}]   ;;  %s1178_s5 = inlined_call_operand.vmem [shape: f32[9,8,256], index: 5, kind: input, shape index: {}]   ;;  %s1179_s4 = inlined_call_operand.vmem [shape: f32[2,1], index: 4, kind: input, shape index: {}]   ;;  %s1180_s3 = inlined_call_operand.vmem [shape: f32[2,4], index: 3, kind: input, shape index: {}]   ;;  %s1181_s6 = inlined_call_operand.vmem [shape: f32[2,256], index: 6, kind: output, shape index: {}]  }
   0x1   :  { %v23_v0 = vld [vmem:[%s1175_s0] sm:$0xff]  ;;  %101 = vmatprep.mubr.f32.mxu0 %v1004_v1  ;;  %189 = vmatprep.mubr.f32.mxu1 %v1004_v1  ;;  %v24_v2 = vld [vmem:[%s1175_s0 + $0x8] sm:$0xff]  ;;  %v947_v3 = vld [vmem:[%s1176_s1 + $0x10] sm:$0xf]  ;;  %s1007_s29 = smov 15   ;;  %s1008_s30 = smov 1  }
   0x2   :  { %198 = vrot.lane.b32.xlu1 %v23_v0, %s1005_s23  ;;  %108 = vrot.lane.b32.xlu0 %v23_v0, %s1006_s24  ;;  %s1009_s0 = smov 127   ;;  %s1010_s7 = smov 113   ;;  %v27_v5 = vld [vmem:[%s1177_s2] sm:$0xf]  ;;  %v1065_v7 = vand.u32 127, %v112_v6  ;;  %v950_v10 = vld [vmem:[%s1178_s5 + $0x10] sm:$0xff] }
   0x3   :  { %67 = vmatprep.subr.mxu0 %v24_v2  ;;  %994 = vset.pattern.permute.xlu0 %v1011_v4  ;;  %s1012_s8 = smov 112   ;;  %s1013_s9 = smov 111   ;;  %v951_v11 = vld [vmem:[%s1178_s5 + $0x18] sm:$0xff]  ;;  %v118_v12 = vld [vmem:[%s1178_s5 + $0x8] sm:$0xff]  ;;  %v117_v13 = vld [vmem:[%s1178_s5] sm:$0xff]  ;;  %vm841_vm9 = vcmask 1043456  }
   0x4   :  { %68 = vmatpush1.msra.mxu0 %v23_v0  ;;  %995 = vset.pattern.permute.xlu1 %v1011_v4  ;;  %vm202_vm1 = vcmp.lt.s32.totalorder %v1065_v7, 16  ;;  %vm114_vm2 = vcmp.lt.s32.totalorder %v1065_v7, 17  ;;  %vm292_vm3 = vcmp.lt.s32.totalorder %v1065_v7, 15  ;;  %v954_v23 = vld [vmem:[%s1178_s5 + $0x20] sm:$0xff]  ;;  %v955_v25 = vld [vmem:[%s1178_s5 + $0x28] sm:$0xff]  ;;  %vm382_vm4 = vcmp.lt.s32.totalorder %v1065_v7, 1 }
   0x5   :  { %948 = vmatmul.mubr.msk.f32.vlgmr.msra.gmra.mxu0 %vm33_vm0, %v947_v3  ;;  %v121_v26 = vld [vmem:[%s1176_s1] sm:$0xf]  ;;  %v952_v27 = vld [vmem:[%s1176_s1 + $0x4] sm:$0xf]  ;;  %v958_v34 = vld [vmem:[%s1178_s5 + $0x30] sm:$0xff]  ;;  %vm472_vm5 = vcmp.lt.s32.totalorder %v1065_v7, 127 }
   0x6   :  { %200 = vrot.lane.b32.xlu1 %v24_v2, %s1005_s23  ;;  %110 = vrot.lane.b32.xlu0 %v24_v2, %s1006_s24  ;;  %v959_v35 = vld [vmem:[%s1178_s5 + $0x38] sm:$0xff]  ;;  %v956_v36 = vld [vmem:[%s1176_s1 + $0x8] sm:$0xf]  ;;  %vm562_vm6 = vcmp.lt.s32.totalorder %v1065_v7, 113  ;;  %vm652_vm7 = vcmp.lt.s32.totalorder %v1065_v7, 112  ;;  %vm742_vm8 = vcmp.lt.s32.totalorder %v1065_v7, 111 }
   0x7   :  { %279 = vmatprep.mubr.f32.mxu0 %v1004_v1  ;;  %v962_v43 = vld [vmem:[%s1178_s5 + $0x50] sm:$0xff]  ;;  %v963_v44 = vld [vmem:[%s1178_s5 + $0x58] sm:$0xff]  ;;  %v960_v45 = vld [vmem:[%s1176_s1 + $0xc] sm:$0xf]  ;;  %vm837_vm10 = vcmask 31744  }
   0x8   :  { %v966_v52 = vld [vmem:[%s1178_s5 + $0x60] sm:$0xff]  ;;  %v967_v53 = vld [vmem:[%s1178_s5 + $0x68] sm:$0xff]  ;;  %v964_v54 = vld [vmem:[%s1176_s1 + $0x14] sm:$0xf] }
   0x9   :  { %v970_v61 = vld [vmem:[%s1178_s5 + $0x70] sm:$0xff]  ;;  %v971_v62 = vld [vmem:[%s1178_s5 + $0x78] sm:$0xff] }
   0xa   :  { %290 = vrot.lane.b32.xlu1 %v24_v2, %s1007_s29  ;;  %288 = vrot.lane.b32.xlu0 %v23_v0, %s1007_s29  ;;  %v968_v63 = vld [vmem:[%s1176_s1 + $0x18] sm:$0xf] }
   0xe   :  { %380 = vrot.lane.b32.xlu1 %v24_v2, %s1008_s30  ;;  %378 = vrot.lane.b32.xlu0 %v23_v0, %s1008_s30 }
  0x12   :  { %470 = vrot.lane.b32.xlu1 %v24_v2, %s1009_s0  ;;  %468 = vrot.lane.b32.xlu0 %v23_v0, %s1009_s0 }
  0x16   :  { %560 = vrot.lane.b32.xlu1 %v24_v2, %s1010_s7  ;;  %558 = vrot.lane.b32.xlu0 %v23_v0, %s1010_s7 }
  0x1a   :  { %650 = vrot.lane.b32.xlu1 %v24_v2, %s1012_s8  ;;  %648 = vrot.lane.b32.xlu0 %v23_v0, %s1012_s8 }
  0x1e   :  { %740 = vrot.lane.b32.xlu1 %v24_v2, %s1013_s9  ;;  %738 = vrot.lane.b32.xlu0 %v23_v0, %s1013_s9 }
  0x22   :  { %30 = vperm.xlu0 %994, %v27_v5  }
  0x74   :  { %v199_v8 = vpop.permute.xlu1 %198  ;;  %v109_v9 = vpop.permute.xlu0 %108 }
  0x78   :  { %v201_v14 = vpop.permute.xlu1 %200  ;;  %v111_v15 = vpop.permute.xlu0 %110 }
  0x79   :  { %v203_v16 = vsel %vm202_vm1, %v199_v8, %v201_v14  ;;  %v204_v17 = vsel %vm202_vm1, %v201_v14, %v199_v8  ;;  %v116_v18 = vsel %vm114_vm2, %v111_v15, %v109_v9  ;;  %v115_v19 = vsel %vm114_vm2, %v109_v9, %v111_v15  ;;  %v974_v8 = vld [vmem:[%s1178_s5 + $0x80] sm:$0xff]  ;;  %v975_v9 = vld [vmem:[%s1178_s5 + $0x88] sm:$0xff] }
  0x7a   :  { %v208_v20 = vmul.f32 %v950_v10, %v204_v17  ;;  %v209_v21 = vmul.f32 %v951_v11, %v203_v16  ;;  %v120_v22 = vmul.f32 %v118_v12, %v115_v19  ;;  %v119_v24 = vmul.f32 %v117_v13, %v116_v18  ;;  %v972_v10 = vld [vmem:[%s1176_s1 + $0x1c] sm:$0xf]  ;;  %v976_v16 = vld [vmem:[%s1176_s1 + $0x20] sm:$0xf] }
  0x7b   :  { %v831_v17 = vld [vmem:[%s1179_s4] sm:$0x3] }
  0x7c   :  { %v291_v28 = vpop.permute.xlu1 %290  ;;  %155 = vmatprep.subr.mxu1 %v120_v22  ;;  %v289_v29 = vpop.permute.xlu0 %288  ;;  %245 = vmatprep.subr.mxu0 %v209_v21 }
  0x7d   :  { %v293_v30 = vsel %vm292_vm3, %v289_v29, %v291_v28  ;;  %v294_v31 = vsel %vm292_vm3, %v291_v28, %v289_v29  ;;  %156 = vmatpush1.msra.mxu1 %v119_v24  ;;  %246 = vmatpush1.msra.mxu0 %v208_v20 }
  0x7e   :  { %v298_v32 = vmul.f32 %v954_v23, %v294_v31  ;;  %v299_v33 = vmul.f32 %v955_v25, %v293_v30  ;;  %949 = vmatmul.mubr.msk.f32.vlgmr.msra.gmra.mxu1 %vm33_vm0, %v121_v26  ;;  %953 = vmatmul.mubr.msk.f32.vlgmr.msra.gmra.mxu0 %vm33_vm0, %v952_v27 }
  0x7f   :  { %369 = vmatprep.mubr.f32.mxu1 %v1004_v1  ;;  %459 = vmatprep.mubr.f32.mxu0 %v1004_v1 }
  0x80   :  { %v381_v37 = vpop.permute.xlu1 %380  ;;  %335 = vmatprep.subr.mxu1 %v299_v33  ;;  %v379_v38 = vpop.permute.xlu0 %378  ;;  %834 = vperm.xlu1 %995, %v831_v17  }
  0x81   :  { %v383_v39 = vsel %vm382_vm4, %v379_v38, %v381_v37  ;;  %v384_v40 = vsel %vm382_vm4, %v381_v37, %v379_v38  ;;  %336 = vmatpush1.msra.mxu1 %v298_v32 }
  0x82   :  { %v388_v41 = vmul.f32 %v958_v34, %v384_v40  ;;  %v389_v42 = vmul.f32 %v959_v35, %v383_v39  ;;  %957 = vmatmul.mubr.msk.f32.vlgmr.msra.gmra.mxu1 %vm33_vm0, %v956_v36 }
  0x83   :  { %549 = vmatprep.mubr.f32.mxu1 %v1004_v1 }
  0x84   :  { %v471_v46 = vpop.permute.xlu1 %470  ;;  %v469_v47 = vpop.permute.xlu0 %468  ;;  %425 = vmatprep.subr.mxu0 %v389_v42 }
  0x85   :  { %v473_v48 = vsel %vm472_vm5, %v469_v47, %v471_v46  ;;  %v474_v49 = vsel %vm472_vm5, %v471_v46, %v469_v47  ;;  %426 = vmatpush1.msra.mxu0 %v388_v41 }
  0x86   :  { %v478_v50 = vmul.f32 %v962_v43, %v473_v48  ;;  %v479_v51 = vmul.f32 %v963_v44, %v474_v49  ;;  %961 = vmatmul.mubr.msk.f32.vlgmr.msra.gmra.mxu0 %vm33_vm0, %v960_v45 }
  0x87   :  { %639 = vmatprep.mubr.f32.mxu0 %v1004_v1 }
  0x88   :  { %v561_v55 = vpop.permute.xlu1 %560  ;;  %515 = vmatprep.subr.mxu1 %v479_v51  ;;  %v559_v56 = vpop.permute.xlu0 %558 }
  0x89   :  { %v563_v57 = vsel %vm562_vm6, %v559_v56, %v561_v55  ;;  %v564_v58 = vsel %vm562_vm6, %v561_v55, %v559_v56  ;;  %516 = vmatpush1.msra.mxu1 %v478_v50  ;;  %v830_v56 = vld [vmem:[%s1180_s3] sm:$0x3] }
  0x8a   :  { %v568_v59 = vmul.f32 %v966_v52, %v563_v57  ;;  %v569_v60 = vmul.f32 %v967_v53, %v564_v58  ;;  %965 = vmatmul.mubr.msk.f32.vlgmr.msra.gmra.mxu1 %vm33_vm0, %v964_v54 }
  0x8b   :  { %729 = vmatprep.mubr.f32.mxu1 %v1004_v1 }
  0x8c   :  { %v651_v0 = vpop.permute.xlu1 %650  ;;  %v649_v2 = vpop.permute.xlu0 %648  ;;  %605 = vmatprep.subr.mxu0 %v569_v60 }
  0x8d   :  { %v653_v3 = vsel %vm652_vm7, %v649_v2, %v651_v0  ;;  %v654_v4 = vsel %vm652_vm7, %v651_v0, %v649_v2  ;;  %606 = vmatpush1.msra.mxu0 %v568_v59 }
  0x8e   :  { %v658_v5 = vmul.f32 %v970_v61, %v653_v3  ;;  %v659_v6 = vmul.f32 %v971_v62, %v654_v4  ;;  %969 = vmatmul.mubr.msk.f32.vlgmr.msra.gmra.mxu0 %vm33_vm0, %v968_v63 }
  0x8f   :  { %819 = vmatprep.mubr.f32.mxu0 %v1004_v1 }
  0x90   :  { %v741_v11 = vpop.permute.xlu1 %740  ;;  %695 = vmatprep.subr.mxu1 %v659_v6  ;;  %v739_v12 = vpop.permute.xlu0 %738 }
  0x91   :  { %v743_v7 = vsel %vm742_vm8, %v739_v12, %v741_v11  ;;  %v744_v13 = vsel %vm742_vm8, %v741_v11, %v739_v12  ;;  %696 = vmatpush1.msra.mxu1 %v658_v5 }
  0x92   :  { %v748_v14 = vmul.f32 %v974_v8, %v743_v7  ;;  %v749_v15 = vmul.f32 %v975_v9, %v744_v13  ;;  %973 = vmatmul.mubr.msk.f32.vlgmr.msra.gmra.mxu1 %vm33_vm0, %v972_v10 }
  0x93   :  { %912 = vmatprep.mubr.f32.mxu1 %v1004_v1 }
  0x94   :  { %785 = vmatprep.subr.mxu0 %v749_v15 }
  0x95   :  { %786 = vmatpush1.msra.mxu0 %v748_v14 }
  0x96   :  { %977 = vmatmul.mubr.msk.f32.vlgmr.msra.gmra.mxu0 %vm33_vm0, %v976_v16 }
  0x9d   :  { %v31_v19 = vpop.permute.xlu0 %30 }
  0xc5   :  { %v103_v18 = vpop.f32.mrf.mxu0 }
  0xc6   :  { %v104_v21 = vadd.f32 %v103_v18, %v31_v19 }
  0xc7   :  { %v105_v20 = vpop.f32.mrf.mxu0 }
  0xc8   :  { %v106_v22 = vadd.f32 %v105_v20, %v31_v19 }
  0xfb   :  { %v835_v57 = vpop.permute.xlu1 %834 }
 0x13e   :  { %v191_v23 = vpop.f32.mrf.mxu1  ;;  %v281_v24 = vpop.f32.mrf.mxu0 }
 0x13f   :  { %v196_v25 = vadd.f32 %v191_v23, %v104_v21 }
 0x140   :  { %v193_v26 = vpop.f32.mrf.mxu1  ;;  %v283_v27 = vpop.f32.mrf.mxu0 }
 0x141   :  { %v197_v1 = vadd.f32 %v193_v26, %v106_v22  ;;  %v286_v28 = vadd.f32 %v281_v24, %v196_v25 }
 0x142   :  { %v371_v29 = vpop.f32.mrf.mxu1 }
 0x143   :  { %v287_v30 = vadd.f32 %v283_v27, %v197_v1  ;;  %v376_v31 = vadd.f32 %v371_v29, %v286_v28 }
 0x144   :  { %v373_v32 = vpop.f32.mrf.mxu1 }
 0x145   :  { %v377_v34 = vadd.f32 %v373_v32, %v287_v30 }
 0x146   :  { %v461_v33 = vpop.f32.mrf.mxu0 }
 0x147   :  { %v466_v35 = vadd.f32 %v461_v33, %v376_v31 }
 0x148   :  { %v463_v36 = vpop.f32.mrf.mxu0 }
 0x149   :  { %v467_v38 = vadd.f32 %v463_v36, %v377_v34 }
 0x14a   :  { %v551_v37 = vpop.f32.mrf.mxu1 }
 0x14b   :  { %v556_v39 = vadd.f32 %v551_v37, %v466_v35 }
 0x14c   :  { %v553_v40 = vpop.f32.mrf.mxu1 }
 0x14d   :  { %v557_v42 = vadd.f32 %v553_v40, %v467_v38 }
 0x14e   :  { %v641_v41 = vpop.f32.mrf.mxu0 }
 0x14f   :  { %v646_v43 = vadd.f32 %v641_v41, %v556_v39 }
 0x150   :  { %v643_v44 = vpop.f32.mrf.mxu0 }
 0x151   :  { %v647_v46 = vadd.f32 %v643_v44, %v557_v42 }
 0x152   :  { %v731_v45 = vpop.f32.mrf.mxu1 }
 0x153   :  { %v736_v47 = vadd.f32 %v731_v45, %v646_v43 }
 0x154   :  { %v733_v48 = vpop.f32.mrf.mxu1 }
 0x155   :  { %v737_v50 = vadd.f32 %v733_v48, %v647_v46 }
 0x156   :  { %v821_v49 = vpop.f32.mrf.mxu0 }
 0x157   :  { %v826_v51 = vadd.f32 %v821_v49, %v736_v47 }
 0x158   :  { %v823_v52 = vpop.f32.mrf.mxu0 }
 0x159   :  { %v827_v53 = vadd.f32 %v823_v52, %v737_v50  ;;  %v828_v55 = vmax.f32 %v826_v51, 0.0 }
 0x15b   :  { %v829_v54 = vmax.f32 %v827_v53, 0.0 }
 0x15d   :  { %978 = vmatprep.subr.msk.mxu1 %vm841_vm9, %v829_v54 }
 0x15e   :  { %979 = vmatpush1.msk.msra.mxu1 %vm841_vm9, %v828_v55 }
 0x15f   :  { %980 = vmatmul.mubr.msk.f32.vlgmr.msra.gmra.mxu1 %vm837_vm10, %v830_v56 }
 0x21f   :  { %v914_v58 = vpop.f32.mrf.mxu1 }
 0x220   :  { %v915_v59 = vadd.f32 %v914_v58, %v835_v57 }
 0x221   :  { %v916_v60 = vpop.f32.mrf.mxu1 }
 0x222   :  { %v981_v61 = vmul.f32 -1.442695, %v915_v59  ;;  %v917_v62 = vadd.f32 %v916_v60, %v835_v57 }
 0x224   :  { %996 = vpow2.f32 %v981_v61  ;;  %v982_v63 = vmul.f32 -1.442695, %v917_v62 }
 0x226   :  { %998 = vpow2.f32 %v982_v63 }
 0x231   :  { %v997_v0 = vpop.eup %996 }
 0x232   :  { %v925_v2 = vadd.f32 1.0, %v997_v0 }
 0x233   :  { %v999_v3 = vpop.eup %998 }
 0x234   :  { %v926_v4 = vadd.f32 1.0, %v999_v3  ;;  %1000 = vrcp.f32 %v925_v2 }
 0x236   :  { %1002 = vrcp.f32 %v926_v4 }
 0x241   :  { %v1001_v5 = vpop.eup %1000 }
 0x243   :  { %v1003_v6 = vpop.eup %1002 }
 0x244   :  { %v933_v8 = vcombine.low %v1001_v5, %v1003_v6 }
 0x246   :  { %983 = vst.sshfl [vmem:[%s1181_s6] sm:$0x33 pattern:$0x76325410] %v933_v8 }

</bundles_post_ra>
